<compile_context>
chip_gen: v7x
topology: tpu7x:2x2x1
jax: 0.10.0
libtpu: 0.0.40
codegen_flags: <defaults>
</compile_context>

<pallas_src>
import copy
import numpy as np
import jax
import jax.numpy as jnp
from jax.experimental import pallas as pl
from jax.experimental.pallas import tpu as pltpu


# -------------------- host-side hop bookkeeping (mirrors __init__) --------------------
def make_adjacency_list(A):
    num_nodes = len(A)
    adj_list = dict()
    for i in range(num_nodes):
        adj_list[str(i)] = [[j, False] for j in range(num_nodes) if int(A[i, j]) != 0]
    return adj_list


def find_k_hops(node, k, collector, collector_plus, adj_list):
    # faithful replica of Hier_LCN.__find_k_hops
    for ele in adj_list:
        if int(ele) != node:
            for each in adj_list[ele]:
                if each[0] == node:
                    each[1] = True
                    break
    if k != 0:
        for each in adj_list[str(node)]:
            if not each[-1]:
                collector_plus.append(each[0])
                find_k_hops(each[0], k - 1, collector, collector_plus, adj_list)
    else:
        collector.append(node)


def xavier_uniform(rng, shape):
    if len(shape) == 2:
        fan_in, fan_out = shape[0], shape[1]
    else:
        rf = int(np.prod(shape[2:]))
        fan_in, fan_out = shape[1] * rf, shape[0] * rf
    bound = float(np.sqrt(6.0 / (fan_in + fan_out)))
    return rng.uniform(-bound, bound, size=shape).astype(np.float32)


def build_hier_lcn_params(A_struct, S, L, d, num_nodes, in_dim, seed=0):
    """Fold weights_S / weights_L into one dense tensor W_all (zeros where a node
    is not in the relevant hop set), then fold Wa in and flatten for the kernel."""
    rng = np.random.default_rng(seed)
    adj_master = make_adjacency_list(A_struct)

    S_hops_away = []
    for i in range(num_nodes):
        collector, collector_plus = [], [i]
        find_k_hops(i, S, collector, collector_plus, copy.deepcopy(adj_master))
        S_hops_away.append(collector_plus)

    L_hops_away = []
    for i in range(num_nodes):
        holder = dict()
        for j in range(S + 1, L + 1):
            collector, collector_plus = [], []
            find_k_hops(i, j, collector, collector_plus, copy.deepcopy(adj_master))
            holder[str(j)] = collector
        L_hops_away.append(holder)

    c_k_out, total_L_dim = {}, 0
    for k in range(S + 1, L + 1):
        c = int(d ** (k - L) * in_dim)
        c_k_out[str(k)] = c
        total_L_dim += c

    out_dim = in_dim                      # module default out_dim == in_dim
    Da = out_dim + total_L_dim            # columns of the fused H_a = [H_S | H_L]

    W_all = np.zeros((num_nodes, num_nodes, in_dim, Da), dtype=np.float32)
    for i in range(num_nodes):
        WS_i = xavier_uniform(rng, (len(S_hops_away[i]), in_dim, in_dim))
        for j, idx in enumerate(S_hops_away[i]):
            W_all[i, idx, :, :in_dim] += WS_i[j]
    off = in_dim
    for k in range(S + 1, L + 1):
        ck = c_k_out[str(k)]
        for i in range(num_nodes):
            lst = L_hops_away[i][str(k)]
            if len(lst) != 0:
                WL = xavier_uniform(rng, (len(lst), in_dim, ck))
                for j, idx in enumerate(lst):
                    W_all[i, idx, :, off:off + ck] += WL[j]
        off += ck

    Wa = xavier_uniform(rng, (out_dim + total_L_dim, out_dim))
    gamma = np.ones((1, out_dim), np.float32)     # BatchNorm1d weight init
    beta = np.zeros((1, out_dim), np.float32)     # BatchNorm1d bias init
    alpha = np.full((1, 1), 0.25, np.float32)     # PReLU init

    # Fold Wa into the hop weights (everything before BN is linear) and flatten
    # the (neighbour, channel) contraction axis -> one long-K matmul per node.
    # Stored in bf16: this is the dominant HBM stream of the layer.
    W_eff = np.einsum('inca,ao->inco', W_all, Wa)                 # (N, N, Cin, out)
    W_eff_flat = np.ascontiguousarray(
        W_eff.reshape(num_nodes, num_nodes * in_dim, out_dim))
    W_eff_bf16 = jnp.asarray(W_eff_flat, dtype=jnp.bfloat16)

    return dict(W_all=W_all, Wa=Wa, W_eff=W_eff_bf16, gamma=gamma, beta=beta,
                alpha=alpha, Da=Da, out_dim=out_dim)


# -------------------------------- Pallas kernels --------------------------------
def _hier_node_block_kernel(a_ref, f_ref, e_ref, w_ref, h_ref, stats_ref):
    # a_ref    : (1, Tn*B, N)   bf16 runtime adjacency rows of this node block
    # f_ref    : (B, K)         bf16 features, (node, channel) flattened; resident
    # e_ref    : (N, K)         bf16 static 0/1 channel-expansion matrix; resident
    # w_ref    : (Tn, K, Do)    bf16 folded (hop weights @ Wa) -> dominant HBM stream
    # h_ref    : (1, B, Tn*Do)  f32 pre-BatchNorm hidden, lane-dense block
    # stats_ref: (1, 2, Do)     f32 per-block [sum(H); sum(H*H)] BatchNorm partials
    Tn, K, Do = w_ref.shape
    B = f_ref.shape[0]

    f = f_ref[...]                                                # (B, K) bf16

    # One batched MXU matmul replicates each adjacency entry across the Cin
    # channels of its neighbour for the whole node block (expand matrix is a
    # precomputed host-side constant; 0/1 selection -> accumulation is exact).
    a_exp = jnp.dot(a_ref[0], e_ref[...],
                    preferred_element_type=jnp.float32)           # (Tn*B, K)
    a_exp = a_exp.astype(jnp.bfloat16)

    ones_b = jnp.ones((1, B), dtype=jnp.float32)
    s1 = jnp.zeros((1, Do), dtype=jnp.float32)
    s2 = jnp.zeros((1, Do), dtype=jnp.float32)
    h_parts = []
    for t in range(Tn):                  # small static trip count (fully unrolled)
        x_t = a_exp[t * B:(t + 1) * B, :] * f                     # (B, K) bf16
        # one long-K (K = N*Cin) matmul on the MXU, f32 accumulation
        h_t = jnp.dot(x_t, w_ref[t],
                      preferred_element_type=jnp.float32)         # (B, Do) f32
        # BN partials accumulated in-loop from values already in vregs
        # (ones-row matmuls stay on the MXU; no second pass over H, no reshape).
        s1 = s1 + jnp.dot(ones_b, h_t, preferred_element_type=jnp.float32)
        s2 = s2 + jnp.dot(ones_b, h_t * h_t, preferred_element_type=jnp.float32)
        h_parts.append(h_t)

    # single lane-dense store of the whole node block (Tn*Do lanes wide)
    h_ref[0] = jnp.concatenate(h_parts, axis=-1)                  # (B, Tn*Do)
    stats_ref[0] = jnp.concatenate([s1, s2], axis=0)              # (2, Do)


def _bn_prelu_kernel(h_ref, scale_ref, shift_ref, alpha_ref, out_ref):
    # h_ref/out_ref: (1, B, Tn*Do) lane-dense blocks
    # scale_ref    : (1, Tn*Do)  gamma * rsqrt(var + eps), tiled per node in block
    # shift_ref    : (1, Tn*Do)  beta - mean * gamma * rsqrt(var + eps), tiled
    # alpha_ref    : (1, 1) SMEM PReLU slope
    y = h_ref[0] * scale_ref[...] + shift_ref[...]                # (B, Tn*Do)
    a = alpha_ref[0, 0]
    out_ref[0] = jnp.where(y > 0.0, y, a * y)


# ---------------------------------- wrapper ----------------------------------
def _vmem_capacity_bytes():
    try:
        cap = int(pltpu.get_tpu_info().vmem_capacity_bytes)
        if cap > 0:
            return cap
    except Exception:
        pass
    return 64 * 1024 * 1024   # conservative fallback (v7x per-core VMEM)


def _pick_node_block(N, B, Cin, out_dim, vmem_limit_bytes):
    """Largest node block whose double-buffered W_eff slab (+ resident f/expand
    inputs and per-step temporaries) fits the VMEM limit.  Prefers Gn >= 2 so
    both TensorCores of dual-core chips get work, and lane-dense H blocks
    (Tn*out_dim a multiple of 128)."""
    K = N * Cin
    per_node_w = K * out_dim * 2                         # bf16 weight slab per node
    resident = (B * K + N * K) * 2                       # f + expand (bf16, resident)
    usable = int(vmem_limit_bytes * 0.75) - resident

    def fits(t):
        need = 2 * t * per_node_w                        # double-buffered weight slab
        need += 2 * (t * B * N * 2 + B * t * out_dim * 4)  # A / H blocks (x2 buffers)
        need += t * B * K * 6                            # a_exp f32 + bf16 temporaries
        return need <= usable

    divisors = [t for t in range(1, N + 1) if N % t == 0]
    lane_dense = [t for t in divisors
                  if (t * out_dim) % 128 == 0 or out_dim % 128 == 0]
    for cand in (
        [t for t in lane_dense if fits(t) and N // t >= 2],
        [t for t in divisors if fits(t) and N // t >= 2],
        [t for t in divisors if fits(t)],
    ):
        if cand:
            return max(cand)
    return 1


def hier_lcn_forward(features, A_rt, params, *, node_block=None):
    B, N, Cin = features.shape
    Do = int(params["out_dim"])
    K = N * Cin
    W_eff = params["W_eff"]                           # (N, K, Do) bf16
    gamma = jnp.asarray(params["gamma"])              # (1, Do)
    beta = jnp.asarray(params["beta"])                # (1, Do)
    alpha = jnp.asarray(params["alpha"])              # (1, 1)

    vmem_cap = _vmem_capacity_bytes()
    vmem_limit = max(32 * 1024 * 1024,
                     min(int(vmem_cap * 0.8), 100 * 1024 * 1024))

    Tn = node_block if node_block is not None else _pick_node_block(
        N, B, Cin, Do, vmem_limit)
    assert N % Tn == 0, "node_block must divide the number of nodes"
    Gn = N // Tn

    # bf16 inputs: x is rounded to bf16 before the long-K matmul anyway, so this
    # loses no accuracy while halving resident VMEM and using the bf16 MXU path.
    A_blk = jnp.transpose(A_rt, (1, 0, 2)).reshape(Gn, Tn * B, N).astype(jnp.bfloat16)
    f_flat = features.reshape(B, K).astype(jnp.bfloat16)

    # Static 0/1 channel-expansion matrix, hoisted out of the kernel: DMA'd once
    # and kept resident (constant index_map), never rebuilt per grid step.
    expand = jnp.asarray(
        np.kron(np.eye(N, dtype=np.float32), np.ones((1, Cin), np.float32)),
        dtype=jnp.bfloat16)                           # (N, K)

    # ---- kernel 1: per-node-block fused hop matmul + BN partial statistics ----
    H_blk, stats = pl.pallas_call(
        _hier_node_block_kernel,
        out_shape=(jax.ShapeDtypeStruct((Gn, B, Tn * Do), jnp.float32),
                   jax.ShapeDtypeStruct((Gn, 2, Do), jnp.float32)),
        grid=(Gn,),
        in_specs=[
            pl.BlockSpec((1, Tn * B, N), lambda i: (i, 0, 0)),
            pl.BlockSpec((B, K), lambda i: (0, 0)),
            pl.BlockSpec((N, K), lambda i: (0, 0)),
            pl.BlockSpec((Tn, K, Do), lambda i: (i, 0, 0)),
        ],
        out_specs=(
            pl.BlockSpec((1, B, Tn * Do), lambda i: (i, 0, 0)),
            pl.BlockSpec((1, 2, Do), lambda i: (i, 0, 0)),
        ),
        compiler_params=pltpu.CompilerParams(
            dimension_semantics=("parallel",),        # node blocks are independent
            vmem_limit_bytes=vmem_limit),
    )(A_blk, f_flat, expand, W_eff)

    # ---- tiny XLA epilogue: fold training-mode BatchNorm1d into scale/shift ----
    count = float(N * B)
    mean = jnp.sum(stats[:, 0, :], axis=0) / count
    var = jnp.maximum(jnp.sum(stats[:, 1, :], axis=0) / count - mean * mean, 0.0)
    rstd = jax.lax.rsqrt(var + 1e-5)
    scale = gamma[0] * rstd
    shift = beta[0] - mean * scale
    scale_t = jnp.tile(scale, Tn)[None, :]            # (1, Tn*Do) matches block cols
    shift_t = jnp.tile(shift, Tn)[None, :]

    # ---- kernel 2: BN apply + PReLU, single vectorized pass per lane-dense block ----
    out_blk = pl.pallas_call(
        _bn_prelu_kernel,
        out_shape=jax.ShapeDtypeStruct((Gn, B, Tn * Do), jnp.float32),
        grid=(Gn,),
        in_specs=[
            pl.BlockSpec((1, B, Tn * Do), lambda i: (i, 0, 0)),
            pl.BlockSpec((1, Tn * Do), lambda i: (0, 0)),
            pl.BlockSpec((1, Tn * Do), lambda i: (0, 0)),
            pl.BlockSpec(memory_space=pltpu.MemorySpace.SMEM),
        ],
        out_specs=pl.BlockSpec((1, B, Tn * Do), lambda i: (i, 0, 0)),
        compiler_params=pltpu.CompilerParams(dimension_semantics=("parallel",)),
    )(H_blk, scale_t, shift_t, alpha)

    # Un-block to (B, N, Do): tiny XLA transpose, negligible next to the W_eff stream.
    out = out_blk.reshape(Gn, B, Tn, Do).transpose(1, 0, 2, 3).reshape(B, N, Do)
    return out


# ------------------------------- pure-JAX reference -------------------------------
def hier_lcn_reference(features, A_rt, params):
    W_all = jnp.asarray(params["W_all"])
    H_a = jnp.einsum('bin,bnc,incd->bid', A_rt, features, W_all)
    H = jnp.einsum('bid,do->bio', H_a, jnp.asarray(params["Wa"]))
    x = H.reshape(-1, H.shape[-1])
    mean = x.mean(0)
    var = ((x - mean) ** 2).mean(0)
    hn = (H - mean) * jax.lax.rsqrt(var + 1e-5)
    hn = hn * params["gamma"][0] + params["beta"][0]
    return jnp.where(hn > 0, hn, 0.25 * hn)


if __name__ == "__main__":
    B, N, Cin = 2, 8, 32
    S, L, d = 1, 2, 2

    # small skeleton-like tree graph
    edges = [(0, 1), (1, 2), (2, 3), (1, 4), (4, 5), (1, 6), (6, 7)]
    A_struct = np.zeros((N, N), np.float32)
    for u, v in edges:
        A_struct[u, v] = 1.0
        A_struct[v, u] = 1.0

    params = build_hier_lcn_params(A_struct, S, L, d, N, Cin, seed=0)

    key = jax.random.PRNGKey(0)
    kf, ka = jax.random.split(key)
    features = jax.random.normal(kf, (B, N, Cin), dtype=jnp.float32)
    A_rt = jax.random.uniform(ka, (B, N, N), dtype=jnp.float32)   # runtime adjacency weights

    out = jax.block_until_ready(hier_lcn_forward(features, A_rt, params))

    ref = jax.block_until_ready(hier_lcn_reference(features, A_rt, params))
    # bf16 A / features / weights in the kernel path vs full-f32 reference.
    np.testing.assert_allclose(np.asarray(out), np.asarray(ref), rtol=5e-2, atol=5e-2)

    print("KERNEL_OK")
</pallas_src>

<mosaic_0001>
module attributes {stable_mosaic.version = 11 : i64} {
  func.func @_hier_node_block_kernel(%arg0: i32, %arg1: memref<1x8x8xbf16, #tpu.memory_space<vmem>>, %arg2: memref<2x256xbf16, #tpu.memory_space<vmem>>, %arg3: memref<8x256xbf16, #tpu.memory_space<vmem>>, %arg4: memref<4x256x32xbf16, #tpu.memory_space<vmem>>, %arg5: memref<1x2x128xf32, #tpu.memory_space<vmem>>, %arg6: memref<1x2x32xf32, #tpu.memory_space<vmem>>) attributes {dimension_semantics = [#tpu.dimension_semantics<parallel>], iteration_bounds = array<i64: 2>, scalar_prefetch = 0 : i64, scratch_operands = 0 : i64, tpu.core_type = #tpu.core_type<tc>, window_params = [{transform_indices = @transform_0, window_bounds = array<i64: 1, 8, 8>}, {pipeline_mode = #tpu.pipeline_mode<synchronous>, transform_indices = @transform_1, window_bounds = array<i64: 2, 256>}, {pipeline_mode = #tpu.pipeline_mode<synchronous>, transform_indices = @transform_2, window_bounds = array<i64: 8, 256>}, {transform_indices = @transform_3, window_bounds = array<i64: 4, 256, 32>}, {transform_indices = @transform_4, window_bounds = array<i64: 1, 2, 128>}, {transform_indices = @transform_5, window_bounds = array<i64: 1, 2, 32>}]} {
    %c0 = arith.constant 0 : index
    %c0_0 = arith.constant 0 : index
    %0 = vector.load %arg2[%c0, %c0_0] : memref<2x256xbf16, #tpu.memory_space<vmem>>, vector<2x256xbf16>
    %c0_1 = arith.constant 0 : index
    %c0_2 = arith.constant 0 : index
    %c0_3 = arith.constant 0 : index
    %1 = vector.load %arg1[%c0_1, %c0_2, %c0_3] : memref<1x8x8xbf16, #tpu.memory_space<vmem>>, vector<1x8x8xbf16>
    %2 = vector.shape_cast %1 : vector<1x8x8xbf16> to vector<8x8xbf16>
    %c0_4 = arith.constant 0 : index
    %c0_5 = arith.constant 0 : index
    %3 = vector.load %arg3[%c0_4, %c0_5] : memref<8x256xbf16, #tpu.memory_space<vmem>>, vector<8x256xbf16>
    %cst = arith.constant dense<0.000000e+00> : vector<8x256xf32>
    %4 = tpu.matmul %2, %3, %cst {dimension_numbers = #tpu.dot_dimension_numbers<[1], [0], [0], [1], [0, 0, 1, 1], [], []>} : vector<8x8xbf16>, vector<8x256xbf16>, vector<8x256xf32> -> vector<8x256xf32>
    %5 = arith.truncf %4 : vector<8x256xf32> to vector<8x256xbf16>
    %cst_6 = arith.constant 1.000000e+00 : f32
    %6 = vector.broadcast %cst_6 : f32 to vector<1x2xf32>
    %cst_7 = arith.constant 0.000000e+00 : f32
    %7 = vector.broadcast %cst_7 : f32 to vector<1x32xf32>
    %cst_8 = arith.constant 0.000000e+00 : f32
    %8 = vector.broadcast %cst_8 : f32 to vector<1x32xf32>
    %9 = vector.extract_strided_slice %5 {offsets = [0, 0], sizes = [2, 256], strides = [1, 1]} : vector<8x256xbf16> to vector<2x256xbf16>
    %10 = arith.mulf %9, %0 : vector<2x256xbf16>
    %c0_9 = arith.constant 0 : index
    %c0_10 = arith.constant 0 : index
    %c0_11 = arith.constant 0 : index
    %11 = vector.load %arg4[%c0_9, %c0_10, %c0_11] : memref<4x256x32xbf16, #tpu.memory_space<vmem>>, vector<1x256x32xbf16>
    %12 = vector.shape_cast %11 : vector<1x256x32xbf16> to vector<256x32xbf16>
    %cst_12 = arith.constant dense<0.000000e+00> : vector<2x32xf32>
    %13 = tpu.matmul %10, %12, %cst_12 {dimension_numbers = #tpu.dot_dimension_numbers<[1], [0], [0], [1], [0, 0, 1, 1], [], []>} : vector<2x256xbf16>, vector<256x32xbf16>, vector<2x32xf32> -> vector<2x32xf32>
    %cst_13 = arith.constant dense<0.000000e+00> : vector<1x32xf32>
    %14 = tpu.matmul %6, %13, %cst_13 {dimension_numbers = #tpu.dot_dimension_numbers<[1], [0], [0], [1], [0, 0, 1, 1], [], []>} : vector<1x2xf32>, vector<2x32xf32>, vector<1x32xf32> -> vector<1x32xf32>
    %15 = arith.addf %7, %14 : vector<1x32xf32>
    %16 = arith.mulf %13, %13 : vector<2x32xf32>
    %cst_14 = arith.constant dense<0.000000e+00> : vector<1x32xf32>
    %17 = tpu.matmul %6, %16, %cst_14 {dimension_numbers = #tpu.dot_dimension_numbers<[1], [0], [0], [1], [0, 0, 1, 1], [], []>} : vector<1x2xf32>, vector<2x32xf32>, vector<1x32xf32> -> vector<1x32xf32>
    %18 = arith.addf %8, %17 : vector<1x32xf32>
    %19 = vector.extract_strided_slice %5 {offsets = [2, 0], sizes = [2, 256], strides = [1, 1]} : vector<8x256xbf16> to vector<2x256xbf16>
    %20 = arith.mulf %19, %0 : vector<2x256xbf16>
    %c1 = arith.constant 1 : index
    %c0_15 = arith.constant 0 : index
    %c0_16 = arith.constant 0 : index
    %21 = vector.load %arg4[%c1, %c0_15, %c0_16] : memref<4x256x32xbf16, #tpu.memory_space<vmem>>, vector<1x256x32xbf16>
    %22 = vector.shape_cast %21 : vector<1x256x32xbf16> to vector<256x32xbf16>
    %cst_17 = arith.constant dense<0.000000e+00> : vector<2x32xf32>
    %23 = tpu.matmul %20, %22, %cst_17 {dimension_numbers = #tpu.dot_dimension_numbers<[1], [0], [0], [1], [0, 0, 1, 1], [], []>} : vector<2x256xbf16>, vector<256x32xbf16>, vector<2x32xf32> -> vector<2x32xf32>
    %cst_18 = arith.constant dense<0.000000e+00> : vector<1x32xf32>
    %24 = tpu.matmul %6, %23, %cst_18 {dimension_numbers = #tpu.dot_dimension_numbers<[1], [0], [0], [1], [0, 0, 1, 1], [], []>} : vector<1x2xf32>, vector<2x32xf32>, vector<1x32xf32> -> vector<1x32xf32>
    %25 = arith.addf %15, %24 : vector<1x32xf32>
    %26 = arith.mulf %23, %23 : vector<2x32xf32>
    %cst_19 = arith.constant dense<0.000000e+00> : vector<1x32xf32>
    %27 = tpu.matmul %6, %26, %cst_19 {dimension_numbers = #tpu.dot_dimension_numbers<[1], [0], [0], [1], [0, 0, 1, 1], [], []>} : vector<1x2xf32>, vector<2x32xf32>, vector<1x32xf32> -> vector<1x32xf32>
    %28 = arith.addf %18, %27 : vector<1x32xf32>
    %29 = vector.extract_strided_slice %5 {offsets = [4, 0], sizes = [2, 256], strides = [1, 1]} : vector<8x256xbf16> to vector<2x256xbf16>
    %30 = arith.mulf %29, %0 : vector<2x256xbf16>
    %c2 = arith.constant 2 : index
    %c0_20 = arith.constant 0 : index
    %c0_21 = arith.constant 0 : index
    %31 = vector.load %arg4[%c2, %c0_20, %c0_21] : memref<4x256x32xbf16, #tpu.memory_space<vmem>>, vector<1x256x32xbf16>
    %32 = vector.shape_cast %31 : vector<1x256x32xbf16> to vector<256x32xbf16>
    %cst_22 = arith.constant dense<0.000000e+00> : vector<2x32xf32>
    %33 = tpu.matmul %30, %32, %cst_22 {dimension_numbers = #tpu.dot_dimension_numbers<[1], [0], [0], [1], [0, 0, 1, 1], [], []>} : vector<2x256xbf16>, vector<256x32xbf16>, vector<2x32xf32> -> vector<2x32xf32>
    %cst_23 = arith.constant dense<0.000000e+00> : vector<1x32xf32>
    %34 = tpu.matmul %6, %33, %cst_23 {dimension_numbers = #tpu.dot_dimension_numbers<[1], [0], [0], [1], [0, 0, 1, 1], [], []>} : vector<1x2xf32>, vector<2x32xf32>, vector<1x32xf32> -> vector<1x32xf32>
    %35 = arith.addf %25, %34 : vector<1x32xf32>
    %36 = arith.mulf %33, %33 : vector<2x32xf32>
    %cst_24 = arith.constant dense<0.000000e+00> : vector<1x32xf32>
    %37 = tpu.matmul %6, %36, %cst_24 {dimension_numbers = #tpu.dot_dimension_numbers<[1], [0], [0], [1], [0, 0, 1, 1], [], []>} : vector<1x2xf32>, vector<2x32xf32>, vector<1x32xf32> -> vector<1x32xf32>
    %38 = arith.addf %28, %37 : vector<1x32xf32>
    %39 = vector.extract_strided_slice %5 {offsets = [6, 0], sizes = [2, 256], strides = [1, 1]} : vector<8x256xbf16> to vector<2x256xbf16>
    %40 = arith.mulf %39, %0 : vector<2x256xbf16>
    %c3 = arith.constant 3 : index
    %c0_25 = arith.constant 0 : index
    %c0_26 = arith.constant 0 : index
    %41 = vector.load %arg4[%c3, %c0_25, %c0_26] : memref<4x256x32xbf16, #tpu.memory_space<vmem>>, vector<1x256x32xbf16>
    %42 = vector.shape_cast %41 : vector<1x256x32xbf16> to vector<256x32xbf16>
    %cst_27 = arith.constant dense<0.000000e+00> : vector<2x32xf32>
    %43 = tpu.matmul %40, %42, %cst_27 {dimension_numbers = #tpu.dot_dimension_numbers<[1], [0], [0], [1], [0, 0, 1, 1], [], []>} : vector<2x256xbf16>, vector<256x32xbf16>, vector<2x32xf32> -> vector<2x32xf32>
    %cst_28 = arith.constant dense<0.000000e+00> : vector<1x32xf32>
    %44 = tpu.matmul %6, %43, %cst_28 {dimension_numbers = #tpu.dot_dimension_numbers<[1], [0], [0], [1], [0, 0, 1, 1], [], []>} : vector<1x2xf32>, vector<2x32xf32>, vector<1x32xf32> -> vector<1x32xf32>
    %45 = arith.addf %35, %44 : vector<1x32xf32>
    %46 = arith.mulf %43, %43 : vector<2x32xf32>
    %cst_29 = arith.constant dense<0.000000e+00> : vector<1x32xf32>
    %47 = tpu.matmul %6, %46, %cst_29 {dimension_numbers = #tpu.dot_dimension_numbers<[1], [0], [0], [1], [0, 0, 1, 1], [], []>} : vector<1x2xf32>, vector<2x32xf32>, vector<1x32xf32> -> vector<1x32xf32>
    %48 = arith.addf %38, %47 : vector<1x32xf32>
    %49 = tpu.concatenate %13, %23, %33, %43 in 1 : vector<2x32xf32>, vector<2x32xf32>, vector<2x32xf32>, vector<2x32xf32> -> vector<2x128xf32>
    %c0_30 = arith.constant 0 : index
    %c0_31 = arith.constant 0 : index
    %c0_32 = arith.constant 0 : index
    %50 = vector.load %arg5[%c0_30, %c0_31, %c0_32] : memref<1x2x128xf32, #tpu.memory_space<vmem>>, vector<1x2x128xf32>
    %51 = vector.shape_cast %50 : vector<1x2x128xf32> to vector<2x128xf32>
    %52 = vector.shape_cast %49 : vector<2x128xf32> to vector<1x2x128xf32>
    tpu.vector_store %arg5[%c0_30, %c0_31, %c0_32], %52 {strides = array<i32>} : memref<1x2x128xf32, #tpu.memory_space<vmem>>, vector<1x2x128xf32>,
    %53 = tpu.concatenate %45, %48 in 0 : vector<1x32xf32>, vector<1x32xf32> -> vector<2x32xf32>
    %c0_33 = arith.constant 0 : index
    %c0_34 = arith.constant 0 : index
    %c0_35 = arith.constant 0 : index
    %54 = vector.load %arg6[%c0_33, %c0_34, %c0_35] : memref<1x2x32xf32, #tpu.memory_space<vmem>>, vector<1x2x32xf32>
    %55 = vector.shape_cast %54 : vector<1x2x32xf32> to vector<2x32xf32>
    %56 = vector.shape_cast %53 : vector<2x32xf32> to vector<1x2x32xf32>
    tpu.vector_store %arg6[%c0_33, %c0_34, %c0_35], %56 {strides = array<i32>} : memref<1x2x32xf32, #tpu.memory_space<vmem>>, vector<1x2x32xf32>,
    return
  }
  func.func @transform_0(%arg0: i32) -> (i32, i32, i32) {
    %c0_i32 = arith.constant 0 : i32
    %c0_i32_0 = arith.constant 0 : i32
    %c0_i32_1 = arith.constant 0 : i32
    return %arg0, %c0_i32, %c0_i32_0 : i32, i32, i32
  }
  func.func @transform_1(%arg0: i32) -> (i32, i32) {
    %c0_i32 = arith.constant 0 : i32
    %c0_i32_0 = arith.constant 0 : i32
    %c0_i32_1 = arith.constant 0 : i32
    return %c0_i32, %c0_i32_0 : i32, i32
  }
  func.func @transform_2(%arg0: i32) -> (i32, i32) {
    %c0_i32 = arith.constant 0 : i32
    %c0_i32_0 = arith.constant 0 : i32
    %c0_i32_1 = arith.constant 0 : i32
    return %c0_i32, %c0_i32_0 : i32, i32
  }
  func.func @transform_3(%arg0: i32) -> (i32, i32, i32) {
    %c0_i32 = arith.constant 0 : i32
    %c0_i32_0 = arith.constant 0 : i32
    %c0_i32_1 = arith.constant 0 : i32
    return %arg0, %c0_i32, %c0_i32_0 : i32, i32, i32
  }
  func.func @transform_4(%arg0: i32) -> (i32, i32, i32) {
    %c0_i32 = arith.constant 0 : i32
    %c0_i32_0 = arith.constant 0 : i32
    %c0_i32_1 = arith.constant 0 : i32
    return %arg0, %c0_i32, %c0_i32_0 : i32, i32, i32
  }
  func.func @transform_5(%arg0: i32) -> (i32, i32, i32) {
    %c0_i32 = arith.constant 0 : i32
    %c0_i32_0 = arith.constant 0 : i32
    %c0_i32_1 = arith.constant 0 : i32
    return %arg0, %c0_i32, %c0_i32_0 : i32, i32, i32
  }
}

</mosaic_0001>

<bundles_post_ra>
// kernel: tpu_custom_call.1
= control target key start
LH: loop header
LB: loop body
LE: loop exit
PB: predicated region body
PF: predicated region fallthrough
CT: control target
= control target key end

     0   :  { %11 = vsyncpa [#allocation3], 0  ;;  %s2753_s0 = inlined_call_operand.vmem [shape: bf16[2,8,8], index: 0, kind: input, shape index: {}]   ;;  %s2754_s1 = inlined_call_operand.vmem [shape: bf16[2,256], index: 1, kind: input, shape index: {}]   ;;  %s2755_s2 = inlined_call_operand.vmem [shape: bf16[8,256], index: 2, kind: input, shape index: {}]   ;;  %s2756_s3 = inlined_call_operand.vmem [shape: bf16[8,256,32], index: 3, kind: input, shape index: {}]   ;;  %s2757_s4 = inlined_call_operand.hbm [shape: f32[2,2,128], index: 4, kind: output, shape index: {0}]   ;;  %s2758_s5 = inlined_call_operand.hbm [shape: f32[2,2,32], index: 5, kind: output, shape index: {1}]  }
   0x1   :  { %13 = vsyncpa [#allocation3 + $0x1], 0 }
   0x2   :  { %14 = vsyncpa [#allocation5], 0 }
   0x3   :  { %16 = vsyncpa [#allocation5 + $0x1], 0  ;;  %s2451_s18 = smov 0   ;;  %s2453_s19 = smov 0  }
   0x4   :  { %s2455_s20 = smov 0   ;;  %s2457_s21 = smov 0  }
   0x5 LB: > { %s2472_s22 = sadd.s32 4294967295, %s2409_s21   ;;  %s1843_s23 = sadd.s32 4294967294, %s2409_s21   ;;  %s2409_s21 = sphi %s2457_s21, %s2764_s21   ;;  %s2405_s20 = sphi %s2455_s20, %s2763_s20   ;;  %s2401_s19 = sphi %s2453_s19, %s2762_s19   ;;  %s2397_s18 = sphi %s2451_s18, %s2761_s18  }
   0x6   : > { %s2476_s24 = sadd.s32 1, %s2409_s21   ;;  %s123_s25 = sadd.s32 1, %s2405_s20 }
   0x7   : > { %s120_s26 = ssub.s32 %s2409_s21, %s2476_s24  ;;  %p133_p0 = scmp.ne.s32.totalorder %s2405_s20, %s2401_s19 }
   0x8   : > { %p121_p1 = scmp.eq.s32.totalorder %s120_s26, 0  ;;  %p134_p2 = scmp.eq.s32.totalorder %s2472_s22, 1 }
   0x9   : > { %p139_p3 = scmp.ne.s32.totalorder %s2401_s19, %s2397_s18  ;;  %p140_p4 = scmp.eq.s32.totalorder %s1843_s23, 1 }
   0xa   : > { %s2487_s27 = scalar_select %p121_p1, %s2405_s20, %s123_s25  }
   0xb   : > { %p2489_p5 = por %p134_p2, %p133_p0  ;;  %p2493_p6 = por %p140_p4, %p139_p3 }
   0xc   : > { %p1846_p7 = scmp.ge.s32.totalorder %s2409_s21, 1  ;;  %p207_p8 = scmp.lt.s32.totalorder %s2409_s21, 3 }
   0xe   : > { %p208_p9 = pnand %p1846_p7, %p207_p8 }
   0xf   : > { %v259_v0 = vld [vmem:[%s2755_s2] sm:$0xff] (!%p208_p9)  ;;  %vm269_vm0 = vcmask (!%p208_p9), 1043456   ;;  %p245_p10 = scmp.lt.s32.totalorder (!%p208_p9), %s2472_s22, 1  ;;  %s1850_s7 = sshll.u32 (!%p208_p9), %s2472_s22, 2  ;;  %v2411_v3 = vmov (!%p208_p9), 0   ;;  %vm265_vm1 = vcmask (!%p208_p9), 64512   ;;  %v323_v33 = vlaneseq (!%p208_p9) }
  0x10   : > { %211 = sbr.rel (%p208_p9) target bundleno = 1201 (0x4b1), region = 36  ;;  %v1854_v1 = vcombine.high (!%p208_p9), %v259_v0, %v259_v0  ;;  %v1853_v2 = vcombine.low (!%p208_p9), %v259_v0, %v259_v0  ;;  %308 = vmatprep.mubr.bf16.mxu0 (!%p208_p9), %v2411_v3  ;;  %p250_p11 = scmp.lt.s32.totalorder (!%p208_p9), %s1850_s7, 7  ;;  %v2412_v31 = vmov (!%p208_p9), 1966171168   ;;  %v257_v36 = vld [vmem:[%s2754_s1] sm:$0x3] (!%p208_p9) }
  0x11   : > { %v321_v32 = vunpack.c.l.s4 (!%p208_p9), %v2412_v31  ;;  %v324_v35 = vshrl.u32 (!%p208_p9), %v323_v33, 7  ;;  %v515_v38 = vcombine.low (!%p208_p9), %v257_v36, %v257_v36  ;;  %vm2414_vm2 = vmmov (!%p208_p9), 0   ;;  %s2415_s25 = smov (!%p208_p9), 32   ;;  %s2417_s26 = smov (!%p208_p9), 64  }
  0x12   : > { %1855 = vmatprep.subr.msk.bf16.mxu0 (!%p208_p9), %vm269_vm0, %v1854_v1  ;;  %v271_v4 = vsel (!%p208_p9), %vm269_vm0, %v1853_v2, 0  ;;  %vm721_vm3 = vcmask (!%p208_p9), 1041408   ;;  %vm717_vm4 = vcmask (!%p208_p9), 15360   ;;  %s2418_s30 = smov (!%p208_p9), 96   ;;  %s2665_s6 = sand.u32 (!%p208_p9), 1, %s2401_s19   ;;  %vm1694_vm5 = vcmask (!%p208_p9), 261120  }
  0x13   : > { %277 = vmatpush1.bf16.msra.mxu0 (!%p208_p9), %v271_v4  ;;  %v322_v34 = vunpack.c.0.s8 (!%p208_p9), %v321_v32  ;;  %vm1696_vm6 = vcmask (!%p208_p9), 523264   ;;  %vm1698_vm7 = vcmask (!%p208_p9), 785408   ;;  %s1709_s14 = scalar_lea.sflag (!%p208_p9), [#allocation3], %s2665_s6 }
  0x15   : > { %v325_v37 = vsub.s32 (!%p208_p9), %v322_v34, %v324_v35 }
  0x17   : > { %s246_s8 = scalar_select %p245_p10, %s2472_s22, 1  ;;  %v326_v39 = vrot.slane %v257_v36, %v325_v37  ;;  %v522_v40 = vrot.slane %v515_v38, %v325_v37 }
  0x18   : > { %s2766_s7 = smov (!%p250_p11, %s1850_s7), 7 }
  0x19   : > { %s1849_s9 = sshll.u32 %s246_s8, 2  ;;  %s2039_s13 = sshll.u32 %s2766_s7, 7  ;;  %v1015_v44 = vcombine.low %v326_v39, %v326_v39  ;;  %v1350_v45 = vcombine.low %v522_v40, %v522_v40  ;;  %v327_v52 = vcombine.high %v326_v39, %v326_v39  ;;  %v523_v53 = vcombine.high %v522_v40, %v522_v40 }
  0x1a   : > { %s248_s12 = scalar_lea.vmem %s2753_s0, %s1849_s9  ;;  %s2511_s16 = scalar_lea.vmem %s2756_s3, %s2039_s13  ;;  %v2552_v54 = vrot.slane %v522_v40, %v325_v37  ;;  %v334_v57 = vrot.slane %v326_v39, %v325_v37 }
  0x1b   : > { %v258_v5 = vld [vmem:[%s248_s12] sm:$0xf]  ;;  %v2254_v10 = vld [vmem:[%s2511_s16 + $0x48] sm:$0xff]   ;;  %v2258_v14 = vld [vmem:[%s2511_s16 + $0x50] sm:$0xff]   ;;  %v2546_v48 = vrot.slane %v1015_v44, %v325_v37  ;;  %v2548_v49 = vrot.slane %v1350_v45, %v325_v37  ;;  %v341_v56 = vrot.slane %v327_v52, %v325_v37  ;;  %v537_v58 = vrot.slane %v523_v53, %v325_v37  ;;  %s1847_s7 = sshll.u32 %s2665_s6, 1  ;;  %s2035_s8 = sshll.u32 %s2472_s22, 5 }
  0x1c   : > { %1856 = vmatmul.mubr.msk.bf16.vlgmr.msra.gmra.mrb[0].mxu0 %vm265_vm1, %v258_v5  ;;  %v2250_v6 = vld [vmem:[%s2511_s16 + $0x40] sm:$0xff]   ;;  %v2255_v11 = vld [vmem:[%s2511_s16 + $0x8] sm:$0xff]   ;;  %v2259_v15 = vld [vmem:[%s2511_s16 + $0x10] sm:$0xff]   ;;  %s237_s9 = scalar_lea.vmem [#allocation2], %s1847_s7  ;;  %s2677_s13 = scalar_lea.hbm %s2757_s4, %s2035_s8 }
  0x1d   : > { %v2251_v7 = vld [vmem:[%s2511_s16] sm:$0xff]   ;;  %2040 = vmatprep.subr.bf16.mxu1 %v2250_v6  ;;  %v2256_v12 = vld [vmem:[%s2511_s16 + $0xc8] sm:$0xff]   ;;  %v2260_v16 = vld [vmem:[%s2511_s16 + $0xd0] sm:$0xff]   ;;  %s1727_s10 = sshll.u32 %s237_s9, 4  ;;  %s2679_s10 = int_to_ptr.vmem [resolvable:$true] %s1727_s10 }
  0x1e   : > { %v2252_v8 = vld [vmem:[%s2511_s16 + $0xc0] sm:$0xff]   ;;  %2041 = vmatpush3.bf16.msra.mxu1 %v2251_v7  ;;  %v2257_v13 = vld [vmem:[%s2511_s16 + $0x88] sm:$0xff]   ;;  %v2261_v17 = vld [vmem:[%s2511_s16 + $0x90] sm:$0xff]   ;;  %s2315_s15 = scalar_lea.vmem %s2679_s10, 32 }
  0x1f   : > { %v2253_v9 = vld [vmem:[%s2511_s16 + $0x80] sm:$0xff]   ;;  %2062 = vmatprep.subr.bf16.mxu0 %v2252_v8  ;;  %2042 = vmatprep.subr.bf16.mxu1 %v2254_v10  ;;  %v2262_v18 = vld [vmem:[%s2511_s16 + $0x58] sm:$0xff]   ;;  %v2270_v26 = vld [vmem:[%s2511_s16 + $0x68] sm:$0xff]   ;;  %v2413_v10 = vmov 0.0   ;;  %p2316_p12 = scmp.ne.s32.totalorder %s2679_s10, %s2315_s15 }
  0x20   : > { %2063 = vmatpush3.bf16.msra.mxu0 %v2253_v9  ;;  %v2263_v19 = vld [vmem:[%s2511_s16 + $0x18] sm:$0xff]   ;;  %v2266_v22 = vld [vmem:[%s2511_s16 + $0x60] sm:$0xff]   ;;  %v2271_v27 = vld [vmem:[%s2511_s16 + $0x28] sm:$0xff]  }
  0x21   : > { %2064 = vmatprep.subr.bf16.mxu0 %v2256_v12  ;;  %v2264_v20 = vld [vmem:[%s2511_s16 + $0xd8] sm:$0xff]   ;;  %v2267_v23 = vld [vmem:[%s2511_s16 + $0x20] sm:$0xff]   ;;  %v2272_v28 = vld [vmem:[%s2511_s16 + $0xe8] sm:$0xff]   ;;  %p2317_p13 = pnand %p2316_p12, %p2489_p5 }
  0x22   : > { %2043 = vmatpush3.bf16.msra.mxu1 %v2255_v11  ;;  %v2265_v21 = vld [vmem:[%s2511_s16 + $0x98] sm:$0xff]   ;;  %v2268_v24 = vld [vmem:[%s2511_s16 + $0xe0] sm:$0xff]   ;;  %v2273_v29 = vld [vmem:[%s2511_s16 + $0xa8] sm:$0xff]  }
  0x23   : > { %2044 = vmatprep.subr.bf16.mxu1 %v2258_v14  ;;  %v2269_v25 = vld [vmem:[%s2511_s16 + $0xa0] sm:$0xff]   ;;  %v2274_v30 = vld [vmem:[%s2511_s16 + $0x70] sm:$0xff]   ;;  %v2278_v46 = vld [vmem:[%s2511_s16 + $0x78] sm:$0xff]   ;;  %p2318_p0 = pneg %p2317_p13 }
  0x24   : > { %2065 = vmatpush3.bf16.msra.mxu0 %v2257_v13  ;;  %v2275_v41 = vld [vmem:[%s2511_s16 + $0x30] sm:$0xff]   ;;  %v2279_v47 = vld [vmem:[%s2511_s16 + $0x38] sm:$0xff]   ;;  %v2291_v33 = vld [vmem:[%s2511_s16 + $0x160] sm:$0xff]  }
  0x25   : > { %2066 = vmatprep.subr.bf16.mxu0 %v2260_v16  ;;  %v2276_v42 = vld [vmem:[%s2511_s16 + $0xf0] sm:$0xff]   ;;  %v2280_v50 = vld [vmem:[%s2511_s16 + $0xf8] sm:$0xff]   ;;  %v2292_v34 = vld [vmem:[%s2511_s16 + $0x120] sm:$0xff]  }
  0x26   : > { %2045 = vmatpush3.bf16.msra.mxu1 %v2259_v15  ;;  %v2277_v43 = vld [vmem:[%s2511_s16 + $0xb0] sm:$0xff]   ;;  %v2282_v51 = vld [vmem:[%s2511_s16 + $0xb8] sm:$0xff]   ;;  %v2293_v35 = vld [vmem:[%s2511_s16 + $0x168] sm:$0xff]  }
  0x27   : > { %2046 = vmatprep.subr.bf16.mxu1 %v2262_v18  ;;  %v2289_v31 = vld [vmem:[%s2511_s16 + $0x158] sm:$0xff]   ;;  %v2294_v36 = vld [vmem:[%s2511_s16 + $0x128] sm:$0xff]   ;;  %v2295_v37 = vld [vmem:[%s2511_s16 + $0x170] sm:$0xff]  }
  0x28   : > { %2067 = vmatpush3.bf16.msra.mxu0 %v2261_v17  ;;  %v2290_v32 = vld [vmem:[%s2511_s16 + $0x118] sm:$0xff]   ;;  %v2296_v38 = vld [vmem:[%s2511_s16 + $0x130] sm:$0xff]   ;;  %v2302_v53 = vld [vmem:[%s2511_s16 + $0x188] sm:$0xff]  }
  0x29   : > { %2068 = vmatprep.subr.bf16.mxu0 %v2264_v20  ;;  %v2297_v39 = vld [vmem:[%s2511_s16 + $0x178] sm:$0xff]  }
  0x2a   : > { %2047 = vmatpush3.bf16.msra.mxu1 %v2263_v19  ;;  %v2298_v40 = vld [vmem:[%s2511_s16 + $0x138] sm:$0xff]  }
  0x2b   : > { %2048 = vmatprep.subr.bf16.mxu1 %v2266_v22  ;;  %v2416_v22 = vmov 1.0  }
  0x2c   : > { %2069 = vmatpush3.bf16.msra.mxu0 %v2265_v21 }
  0x2d   : > { %2070 = vmatprep.subr.bf16.mxu0 %v2268_v24 }
  0x2e   : > { %2049 = vmatpush3.bf16.msra.mxu1 %v2267_v23  ;;  %v2283_v23 = vld [vmem:[%s2511_s16 + $0x140] sm:$0xff]  }
  0x2f   : > { %2050 = vmatprep.subr.bf16.mxu1 %v2270_v26  ;;  %v2285_v26 = vld [vmem:[%s2511_s16 + $0x148] sm:$0xff]  }
  0x30   : > { %2071 = vmatpush3.bf16.msra.mxu0 %v2269_v25  ;;  %v2284_v25 = vld [vmem:[%s2511_s16 + $0x100] sm:$0xff]  }
  0x31   : > { %2072 = vmatprep.subr.bf16.mxu0 %v2272_v28  ;;  %v2286_v28 = vld [vmem:[%s2511_s16 + $0x108] sm:$0xff]  }
  0x32   : > { %2051 = vmatpush3.bf16.msra.mxu1 %v2271_v27 }
  0x33   : > { %2052 = vmatprep.subr.bf16.mxu1 %v2274_v30  ;;  %v2288_v30 = vld [vmem:[%s2511_s16 + $0x110] sm:$0xff]  }
  0x34   : > { %2073 = vmatpush3.bf16.msra.mxu0 %v2273_v29  ;;  %v2287_v29 = vld [vmem:[%s2511_s16 + $0x150] sm:$0xff]  }
  0x35   : > { %2074 = vmatprep.subr.bf16.mxu0 %v2276_v42 }
  0x36   : > { %2053 = vmatpush3.bf16.msra.mxu1 %v2275_v41 }
  0x37   : > { %2054 = vmatprep.subr.bf16.mxu1 %v2278_v46 }
  0x38   : > { %2075 = vmatpush3.bf16.msra.mxu0 %v2277_v43 }
  0x39   : > { %2076 = vmatprep.subr.bf16.mxu0 %v2280_v50 }
  0x3a   : > { %2055 = vmatpush3.bf16.msra.mxu1 %v2279_v47  ;;  %v2299_v47 = vld [vmem:[%s2511_s16 + $0x1c0] sm:$0xff]  }
  0x3b   : > { %2144 = vmatprep.subr.mxu1 %v2413_v10 }
  0x3c   : > { %2077 = vmatpush3.bf16.msra.mxu0 %v2282_v51  ;;  %v2301_v51 = vld [vmem:[%s2511_s16 + $0x1c8] sm:$0xff]  }
  0x3d   : > { %2154 = vmatprep.subr.mxu0 %v2413_v10 }
  0xef   : > { %v310_v55 = vpop.f32.mrb[0].mxu0 }
  0xf0   : > { %v2554_v59 = vpack.c.bf16 %v310_v55, %v310_v55  ;;  %v312_v60 = vpop.f32.mrb[1].mxu0  ;;  %v2303_v55 = vld [vmem:[%s2511_s16 + $0x1d0] sm:$0xff]  }
  0xf1   : > { %v2556_v61 = vpack.c.bf16 %v312_v60, %v312_v60  ;;  %v314_v62 = vpop.f32.mrb[2].mxu0  ;;  %v2308_v60 = vld [vmem:[%s2511_s16 + $0x1a0] sm:$0xff]  }
  0xf2   : > { %v315_v63 = vpop.f32.mrb[3].mxu0  ;;  %v540_v0 = vmul.bf16 %v2552_v54, %v2554_v59  ;;  %v1024_v1 = vmul.bf16 %v2546_v48, %v2554_v59  ;;  %v1359_v2 = vmul.bf16 %v2548_v49, %v2554_v59  ;;  %v344_v7 = vmul.bf16 %v334_v57, %v2554_v59  ;;  %v2300_v48 = vld [vmem:[%s2511_s16 + $0x180] sm:$0xff]   ;;  %v2310_v62 = vld [vmem:[%s2511_s16 + $0x1a8] sm:$0xff]  }
  0xf3   : > { %v345_v3 = vmul.bf16 %v341_v56, %v2556_v61  ;;  %v541_v4 = vmul.bf16 %v537_v58, %v2556_v61  ;;  %v1025_v5 = vmul.bf16 %v334_v57, %v2556_v61  ;;  %v1360_v6 = vmul.bf16 %v2552_v54, %v2556_v61  ;;  %v2304_v54 = vld [vmem:[%s2511_s16 + $0x190] sm:$0xff]   ;;  %v2305_v56 = vld [vmem:[%s2511_s16 + $0x1d8] sm:$0xff]   ;;  %v2307_v58 = vld [vmem:[%s2511_s16 + $0x1e0] sm:$0xff]  }
  0xf4   : > { %v577_v9 = vrot.slane %v540_v0, 1  ;;  %v1061_v41 = vrot.slane %v1024_v1, 2  ;;  %v2306_v57 = vld [vmem:[%s2511_s16 + $0x198] sm:$0xff]   ;;  %v2309_v61 = vld [vmem:[%s2511_s16 + $0x1e8] sm:$0xff]   ;;  %v2311_v63 = vld [vmem:[%s2511_s16 + $0x1f0] sm:$0xff]  }
  0xf5   : > { %506 = vmatprep.mubr.bf16.mxu1 %v345_v3  ;;  %v578_v8 = vrot.slane %v541_v4, 1  ;;  %v1062_v27 = vrot.slane %v1025_v5, 2  ;;  %v1397_v52 = vrot.slane %v1360_v6, 3  ;;  %v2312_v0 = vld [vmem:[%s2511_s16 + $0x1b0] sm:$0xff]   ;;  %v2313_v1 = vld [vmem:[%s2511_s16 + $0x1f8] sm:$0xff]   ;;  %v1396_v4 = vrot.slane %v1359_v2, 3 }
  0xf6   : > { %507 = vmatmul.mubr.bf16.vlgmr.msra.gmra.mrb[0].mxu1 %v344_v7  ;;  %v2314_v3 = vld [vmem:[%s2511_s16 + $0x1b8] sm:$0xff]   ;;  %s2419_s16 = smov [#allocation2]  }
  0xf7   : > { %709 = vmatprep.mubr.bf16.mxu0 %v578_v8  ;;  %2146 = vmatprep.mubr.msk.f32.mxu1 %vm2414_vm2, %v2413_v10  ;;  %s2319_s17 = sshll.u32 %s2419_s16, 4  ;;  %s2320_s17 = int_to_ptr.vmem [resolvable:$false] %s2319_s17 }
  0xf8   : > { %710 = vmatmul.mubr.bf16.vlgmr.msra.gmra.mrb[4].mxu0 %v577_v9  ;;  %s2321_s23 = scalar_lea.vmem %s2320_s17, 64  ;;  %p2322_p1 = scmp.lt.s32.totalorder %s2679_s10, %s2320_s17 }
  0xf9   : > { %2156 = vmatprep.mubr.msk.f32.mxu0 %vm2414_vm2, %v2413_v10  ;;  %p2323_p2 = scmp.lt.s32.totalorder %s2321_s23, %s2315_s15 }
  0xfb   : > { %p2324_p3 = por %p2323_p2, %p2322_p1 }
  0xfd   : > { %p2325_p4 = pnand %p2324_p3, %p2318_p0 }
 0x1c9   : > { %v2056_v11 = vpop.f32.mrb[0].mxu1 }
 0x1ca   : > { %v2057_v12 = vpop.f32.mrb[1].mxu1 }
 0x1cb   : > { %v2576_v13 = vadd.f32 %v2057_v12, %v2056_v11  ;;  %v2059_v14 = vpop.f32.mrb[2].mxu1  ;;  %v2078_v15 = vpop.f32.mrb[4].mxu0 }
 0x1cc   : > { %v2060_v16 = vpop.f32.mrb[3].mxu1  ;;  %v2079_v17 = vpop.f32.mrb[5].mxu0 }
 0x1cd   : > { %v2080_v18 = vadd.f32 %v2079_v17, %v2078_v15  ;;  %v2081_v19 = vpop.f32.mrb[6].mxu0  ;;  %v514_v24 = vmul.f32 %v2576_v13, %v2576_v13 }
 0x1ce   : > { %v2082_v20 = vpop.f32.mrb[7].mxu0 }
 0x1cf   : > { %v868_v21 = vmul.f32 %v2080_v18, %v2080_v18  ;;  %1685 = vrot.lane.b32.xlu0 %v2080_v18, %s2415_s25  ;;  %2145 = vmatpush3.msk.msra.mxu1 %vm721_vm3, %v2080_v18 }
 0x1d0   : > { %2147 = vmatmul.mubr.msk.f32.vlgmr.msra.gmra.mrb[4].mxu1 %vm717_vm4, %v2416_v22  ;;  %2149 = vmatprep.subr.mxu1 %v2413_v10 }
 0x1d1   : > { %2150 = vmatpush3.msk.msra.mxu1 %vm721_vm3, %v2576_v13  ;;  %2155 = vmatpush3.msk.msra.mxu0 %vm721_vm3, %v868_v21 }
 0x1d2   : > { %2159 = vmatprep.subr.mxu0 %v2413_v10  ;;  %2157 = vmatmul.mubr.msk.f32.vlgmr.msra.gmra.mrb[8].mxu0 %vm717_vm4, %v2416_v22 }
 0x1d3   : > { %2160 = vmatpush3.msk.msra.mxu0 %vm721_vm3, %v514_v24  ;;  %2151 = vmatprep.mubr.msk.f32.mxu1 %vm2414_vm2, %v2413_v10 }
 0x1d4   : > { %2092 = vmatprep.subr.bf16.mxu1 %v2283_v23  ;;  %2161 = vmatprep.mubr.msk.f32.mxu0 %vm2414_vm2, %v2413_v10 }
 0x1d5   : > { %2169 = vmatprep.subr.mxu0 %v2413_v10 }
 0x1d8   : > { %2152 = vmatmul.mubr.msk.f32.vlgmr.msra.gmra.mrb[4].mxu1 %vm717_vm4, %v2416_v22 }
 0x1d9   : > { %2093 = vmatpush3.bf16.msra.mxu1 %v2284_v25  ;;  %1193 = vmatprep.mubr.bf16.mxu1 %v1062_v27 }
 0x1da   : > { %2094 = vmatprep.subr.bf16.mxu1 %v2285_v26  ;;  %2162 = vmatmul.mubr.msk.f32.vlgmr.msra.gmra.mrb[8].mxu0 %vm717_vm4, %v2416_v22 }
 0x1db   : > { %2171 = vmatprep.mubr.msk.f32.mxu0 %vm2414_vm2, %v2413_v10 }
 0x1dd   : > { %2095 = vmatpush3.bf16.msra.mxu1 %v2286_v28 }
 0x1de   : > { %2096 = vmatprep.subr.bf16.mxu1 %v2287_v29 }
 0x1e1   : > { %2097 = vmatpush3.bf16.msra.mxu1 %v2288_v30 }
 0x1e2   : > { %2098 = vmatprep.subr.bf16.mxu1 %v2289_v31 }
 0x1e5   : > { %2099 = vmatpush3.bf16.msra.mxu1 %v2290_v32 }
 0x1e6   : > { %2100 = vmatprep.subr.bf16.mxu1 %v2291_v33 }
 0x1e9   : > { %2101 = vmatpush3.bf16.msra.mxu1 %v2292_v34 }
 0x1ea   : > { %2102 = vmatprep.subr.bf16.mxu1 %v2293_v35 }
 0x1ed   : > { %2103 = vmatpush3.bf16.msra.mxu1 %v2294_v36 }
 0x1ee   : > { %2104 = vmatprep.subr.bf16.mxu1 %v2295_v37 }
 0x1f1   : > { %2105 = vmatpush3.bf16.msra.mxu1 %v2296_v38 }
 0x1f2   : > { %2106 = vmatprep.subr.bf16.mxu1 %v2297_v39 }
 0x1f5   : > { %2107 = vmatpush3.bf16.msra.mxu1 %v2298_v40 }
 0x1f6   : > { %2164 = vmatprep.subr.mxu1 %v2413_v10 }
 0x1f8   : > { %1194 = vmatmul.mubr.bf16.vlgmr.msra.gmra.mrb[8].mxu1 %v1061_v41 }
 0x1f9   : > { %2166 = vmatprep.mubr.msk.f32.mxu1 %vm2414_vm2, %v2413_v10 }
 0x241   : > { %v1686_v49 = vpop.permute.xlu0 %1685 }
 0x242   : > { %v1695_v2 = vsel %vm1694_vm5, %v2576_v13, %v1686_v49 }
 0x2cb   : > { %v2108_v42 = vpop.f32.mrb[8].mxu1 }
 0x2cc   : > { %v2109_v43 = vpop.f32.mrb[9].mxu1 }
 0x2cd   : > { %v2110_v44 = vadd.f32 %v2109_v43, %v2108_v42  ;;  %v2111_v45 = vpop.f32.mrb[10].mxu1 }
 0x2ce   : > { %v2112_v46 = vpop.f32.mrb[11].mxu1 }
 0x2cf   : > { %v1275_v50 = vmul.f32 %v2110_v44, %v2110_v44  ;;  %1688 = vrot.lane.b32.xlu0 %v2110_v44, %s2417_s26  ;;  %2165 = vmatpush3.msk.msra.mxu1 %vm721_vm3, %v2110_v44 }
 0x2d0   : > { %2167 = vmatmul.mubr.msk.f32.vlgmr.msra.gmra.mrb[4].mxu1 %vm717_vm4, %v2416_v22  ;;  %2174 = vmatprep.subr.mxu1 %v2413_v10 }
 0x2d1   : > { %2170 = vmatpush3.msk.msra.mxu0 %vm721_vm3, %v1275_v50  ;;  %2176 = vmatprep.mubr.msk.f32.mxu1 %vm2414_vm2, %v2413_v10 }
 0x2d2   : > { %2172 = vmatmul.mubr.msk.f32.vlgmr.msra.gmra.mrb[8].mxu0 %vm717_vm4, %v2416_v22  ;;  %2118 = vmatprep.subr.bf16.mxu0 %v2299_v47 }
 0x2d3   : > { %2119 = vmatpush3.bf16.msra.mxu0 %v2300_v48  ;;  %1528 = vmatprep.mubr.bf16.mxu0 %v1397_v52 }
 0x2d4   : > { %2120 = vmatprep.subr.bf16.mxu0 %v2301_v51 }
 0x2d7   : > { %2121 = vmatpush3.bf16.msra.mxu0 %v2302_v53 }
 0x2d8   : > { %2122 = vmatprep.subr.bf16.mxu0 %v2303_v55 }
 0x2db   : > { %2123 = vmatpush3.bf16.msra.mxu0 %v2304_v54 }
 0x2dc   : > { %2124 = vmatprep.subr.bf16.mxu0 %v2305_v56 }
 0x2df   : > { %2125 = vmatpush3.bf16.msra.mxu0 %v2306_v57 }
 0x2e0   : > { %2126 = vmatprep.subr.bf16.mxu0 %v2307_v58 }
 0x2e3   : > { %2127 = vmatpush3.bf16.msra.mxu0 %v2308_v60 }
 0x2e4   : > { %2128 = vmatprep.subr.bf16.mxu0 %v2309_v61 }
 0x2e7   : > { %2129 = vmatpush3.bf16.msra.mxu0 %v2310_v62 }
 0x2e8   : > { %2130 = vmatprep.subr.bf16.mxu0 %v2311_v63 }
 0x2eb   : > { %2131 = vmatpush3.bf16.msra.mxu0 %v2312_v0 }
 0x2ec   : > { %2132 = vmatprep.subr.bf16.mxu0 %v2313_v1 }
 0x2ef   : > { %2133 = vmatpush3.bf16.msra.mxu0 %v2314_v3 }
 0x2f0   : > { %2179 = vmatprep.subr.mxu0 %v2413_v10 }
 0x2f2   : > { %1529 = vmatmul.mubr.bf16.vlgmr.msra.gmra.mrb[12].mxu0 %v1396_v4 }
 0x2f3   : > { %2181 = vmatprep.mubr.msk.f32.mxu0 %vm2414_vm2, %v2413_v10 }
 0x341   : > { %v1689_v59 = vpop.permute.xlu0 %1688 }
 0x342   : > { %v1697_v10 = vsel %vm1696_vm6, %v1695_v2, %v1689_v59 }
 0x3c5   : > { %v2134_v5 = vpop.f32.mrb[12].mxu0 }
 0x3c6   : > { %v2135_v6 = vpop.f32.mrb[13].mxu0 }
 0x3c7   : > { %v2136_v7 = vadd.f32 %v2135_v6, %v2134_v5  ;;  %v2137_v8 = vpop.f32.mrb[14].mxu0 }
 0x3c8   : > { %v2138_v9 = vpop.f32.mrb[15].mxu0 }
 0x3c9   : > { %v1610_v11 = vmul.f32 %v2136_v7, %v2136_v7  ;;  %1691 = vrot.lane.b32.xlu1 %v2136_v7, %s2418_s30  ;;  %2175 = vmatpush3.msk.msra.mxu1 %vm721_vm3, %v2136_v7 }
 0x3ca   : > { %2177 = vmatmul.mubr.msk.f32.vlgmr.msra.gmra.mrb[4].mxu1 %vm717_vm4, %v2416_v22 }
 0x3cb   : > { %2180 = vmatpush3.msk.msra.mxu0 %vm721_vm3, %v1610_v11 }
 0x3cc   : > { %2182 = vmatmul.mubr.msk.f32.vlgmr.msra.gmra.mrb[8].mxu0 %vm717_vm4, %v2416_v22 }
 0x43b   : > { %v1692_v12 = vpop.permute.xlu1 %1691 }
 0x43c   : > { %v1699_v14 = vsel %vm1698_vm7, %v1697_v10, %v1692_v12 }
 0x43d   : > { %1700 = vst [vmem:[%s237_s9] sm:$0x3] %v1699_v14 }
 0x43e   : > { %2328 = shalt.err (!%p2325_p4)
}
 0x43f   : > { %s2329_s25 = scalar_lea.hbm %s2677_s13, 32  ;;  %s2333_s9 = scalar_lea.hbm %s2757_s4, 64 }
 0x440   : > { %p2330_p7 = scmp.ne.s32.totalorder %s2677_s13, %s2329_s25  ;;  %p2334_p10 = scmp.lt.u32.totalorder %s2677_s13, %s2757_s4 }
 0x441   : > { %p2335_p11 = scmp.lt.u32.totalorder %s2333_s9, %s2329_s25  ;;  %p2337_p13 = scmp.lt.u32.totalorder %s2329_s25, %s2677_s13 }
 0x442   : > { %p2331_p8 = pnand %p2330_p7, %p2489_p5 }
 0x443   : > { %p2336_p12 = por %p2335_p11, %p2334_p10 }
 0x444   : > { %p2332_p9 = pneg %p2331_p8 }
 0x445   : > { %p2338_p0 = por %p2337_p13, %p2336_p12 }
 0x447   : > { %p2339_p1 = pnand %p2338_p0, %p2332_p9 }
 0x449   : > { %2342 = shalt.err (!%p2339_p1)
}
 0x44a   : > { %2196 = dma.vmem_to_hbm [thread:$0]  (%p2489_p5), %s2679_s10, 32, %s2677_s13, %s1709_s14   ;;  %vm1704_vm8 = vcmask 1040384   ;;  %vm1706_vm9 = vcmask 254976  }
 0x44b   : > { %s244_s15 = scalar_lea.vmem [#allocation4], %s1847_s7  ;;  %s2710_s25 = scalar_lea.hbm %s2758_s5, %s2035_s8 }
 0x44c   : > { %s1740_s16 = sshll.u32 %s244_s15, 4  ;;  %s1714_s7 = scalar_lea.sflag [#allocation5], %s2665_s6  ;;  %s2712_s16 = int_to_ptr.vmem [resolvable:$true] %s1740_s16 }
 0x44d   : > { %s2343_s10 = scalar_lea.vmem %s2712_s16, 32  ;;  %s2420_s13 = smov [#allocation4]  }
 0x44e   : > { %p2344_p2 = scmp.ne.s32.totalorder %s2712_s16, %s2343_s10  ;;  %s2347_s22 = sshll.u32 %s2420_s13, 4  ;;  %s2348_s22 = int_to_ptr.vmem [resolvable:$false] %s2347_s22 }
 0x44f   : > { %s2349_s14 = scalar_lea.vmem %s2348_s22, 64  ;;  %p2350_p7 = scmp.lt.s32.totalorder %s2712_s16, %s2348_s22 }
 0x450   : > { %p2345_p3 = pnand %p2344_p2, %p2489_p5  ;;  %p2351_p8 = scmp.lt.s32.totalorder %s2349_s14, %s2343_s10 }
 0x452   : > { %p2346_p4 = pneg %p2345_p3  ;;  %p2352_p9 = por %p2351_p8, %p2350_p7 }
 0x454   : > { %p2353_p10 = pnand %p2352_p9, %p2346_p4 }
 0x49d   : > { %v1605_v13 = vpop.f32.mrb[4].mxu1 }
 0x49e   : > { %v2178_v15 = vpop.f32.mrb[5].mxu1 }
 0x49f   : > { %v1680_v16 = vpop.f32.mrb[8].mxu0 }
 0x4a0   : > { %v1702_v17 = vrot.slane %v1680_v16, 7  ;;  %v2183_v18 = vpop.f32.mrb[9].mxu0 }
 0x4a2   : > { %v1705_v19 = vsel %vm1704_vm8, %v1605_v13, %v1702_v17 }
 0x4a3   : > { %1707 = vst.msk [vmem:[%s244_s15] sm:$0x3] %vm1706_vm9, %v1705_v19 }
 0x4a4   : > { %2356 = shalt.err (!%p2353_p10)
}
 0x4a5   : > { %s2357_s6 = scalar_lea.hbm %s2710_s25, 32  ;;  %s2361_s30 = scalar_lea.hbm %s2758_s5, 64 }
 0x4a6   : > { %p2358_p11 = scmp.ne.s32.totalorder %s2710_s25, %s2357_s6  ;;  %p2362_p0 = scmp.lt.u32.totalorder %s2710_s25, %s2758_s5 }
 0x4a7   : > { %p2363_p1 = scmp.lt.u32.totalorder %s2361_s30, %s2357_s6  ;;  %p2365_p3 = scmp.lt.u32.totalorder %s2357_s6, %s2710_s25 }
 0x4a8   : > { %p2359_p12 = pnand %p2358_p11, %p2489_p5 }
 0x4a9   : > { %p2364_p2 = por %p2363_p1, %p2362_p0 }
 0x4aa   : > { %p2360_p13 = pneg %p2359_p12 }
 0x4ab   : > { %p2366_p4 = por %p2365_p3, %p2364_p2 }
 0x4ad   : > { %p2367_p7 = pnand %p2366_p4, %p2360_p13 }
 0x4af   : > { %2370 = shalt.err (!%p2367_p7)
}
 0x4b0   : > { %2197 = dma.vmem_to_hbm [thread:$0]  (%p2489_p5), %s2712_s16, 32, %s2710_s25, %s1714_s7  }
 0x4b1 PF: > { %p2207_p8 = scmp.ge.s32.totalorder %s2409_s21, 2  ;;  %s1752_s12 = sand.u32 1, %s2397_s18  }
 0x4b2   : > { %s1753_s15 = scalar_lea.sflag [#allocation3], %s1752_s12 }
 0x4b3   : > { %p2201_p9 = pnand %p2207_p8, %p2493_p6 }
 0x4b5   : > { %2388 = dma.done.wait (!%p2201_p9), %s1753_s15, 32  }
 0x4b6   : > { %2390 = vsyncadd (!%p2201_p9), %s1753_s15, 4294967264  ;;  %s1762_s17 = scalar_lea.sflag [#allocation5], %s1752_s12 }
 0x4b7   : > { %2392 = dma.done.wait (!%p2201_p9), %s1762_s17, 32  }
 0x4b8   : > { %2394 = vsyncadd (!%p2201_p9), %s1762_s17, 4294967264  ;;  %p19_p5 = scmp.ge.s32.totalorder %s2476_s24, 4   ;;  %s2761_s18 = smov %s2401_s19 }
 0x4b9   : > { %s2762_s19 = smov %s2405_s20  ;;  %s2763_s20 = smov %s2487_s27 }
 0x4ba   : > { %s2764_s21 = smov %s2476_s24  ;;  %21 = sbr.rel (!%p19_p5) target bundleno = 5 (0x5), region = 94 }
 0x4c1   :  { %1767 = vsyncpa [#allocation3], 1 }
 0x4c2   :  { %1769 = vsyncpa [#allocation3 + $0x1], 1 }
 0x4c3   :  { %1770 = vsyncpa [#allocation5], 1 }
 0x4c4   :  { %1772 = vsyncpa [#allocation5 + $0x1], 1 }

</bundles_post_ra>
